<compile_context>
chip_gen: v5e
topology: v5e:2x2
jax: 0.10.0
libtpu: 0.0.40
codegen_flags: <defaults>
</compile_context>

<pallas_src>
import functools

import jax
import jax.numpy as jnp
from jax.experimental import pallas as pl
from jax.experimental.pallas import tpu as pltpu

LANES = 128


def _round_up(x: int, m: int) -> int:
    return (x + m - 1) // m * m


def _vmem_capacity_bytes() -> int:
    """Per-TensorCore physical VMEM; conservative 64 MiB (v7x) fallback."""
    try:
        cap = int(pltpu.get_tpu_info().vmem_capacity_bytes)
        if cap >= 32 * 1024 * 1024:
            return cap
    except Exception:
        pass
    return 64 * 1024 * 1024


def _probe_buffered_support() -> bool:
    """Check (once, eagerly, outside any jit) that BlockSpec(pipeline_mode=
    pl.Buffered(n)) is accepted by this JAX / Mosaic version."""
    if not hasattr(pl, "Buffered"):
        return False
    try:
        spec = pl.BlockSpec((8, LANES), lambda i: (0, 0),
                            pipeline_mode=pl.Buffered(1))

        def _probe_kernel(x_ref, o_ref):
            o_ref[...] = x_ref[...] + 1.0

        out = pl.pallas_call(
            _probe_kernel,
            out_shape=jax.ShapeDtypeStruct((8, LANES), jnp.float32),
            grid=(1,),
            in_specs=[spec],
            out_specs=pl.BlockSpec((8, LANES), lambda i: (0, 0)),
        )(jnp.zeros((8, LANES), jnp.float32))
        jax.block_until_ready(out)
        return True
    except Exception:
        return False


_BUFFERED_OK = _probe_buffered_support()


def _spec(shape, index_map, buffers=None):
    """BlockSpec with an optional explicit buffer count (graceful fallback to
    default double-buffering if pipeline_mode is unsupported)."""
    if buffers is not None and _BUFFERED_OK:
        return pl.BlockSpec(shape, index_map, pipeline_mode=pl.Buffered(buffers))
    return pl.BlockSpec(shape, index_map)


# ---------------------------------------------------------------------------
# Fused path: whole block in one kernel, weights resident in VMEM.
# ---------------------------------------------------------------------------
def _fused_kernel(x_ref, w1t_ref, b1_ref, w2t_ref, b2_ref, o_ref):
    """One batch tile: o = relu(relu(x@W1^T+b1)**3 @ W2^T + b2)**3 + x."""
    x = x_ref[...]
    x_res = x.astype(jnp.float32)              # residual kept in f32

    # layer 1: (TB, Fp) @ (Fp, Fp) on the MXU, f32 accumulation
    y = jnp.dot(x.astype(w1t_ref.dtype), w1t_ref[...],
                preferred_element_type=jnp.float32)
    y = y + b1_ref[...]
    y = jnp.maximum(y, 0.0)
    y = y * y * y                              # relu(y)**3, f32 epilogue (VPU)

    # layer 2
    y = jnp.dot(y.astype(w2t_ref.dtype), w2t_ref[...],
                preferred_element_type=jnp.float32)
    y = y + b2_ref[...]
    y = jnp.maximum(y, 0.0)
    o_ref[...] = (y * y * y + x_res).astype(o_ref.dtype)


# ---------------------------------------------------------------------------
# Tiled fallback (large F): linear + relu**3 (+ residual) with (M, N, K) grid.
# ---------------------------------------------------------------------------
def _tiled_linear_relu3_kernel(x_ref, wt_ref, b_ref, o_ref, acc_ref):
    @pl.when(pl.program_id(2) == 0)
    def _():
        acc_ref[...] = jnp.zeros_like(acc_ref)

    acc_ref[...] += jnp.dot(x_ref[...].astype(wt_ref.dtype), wt_ref[...],
                            preferred_element_type=jnp.float32)

    @pl.when(pl.program_id(2) == pl.num_programs(2) - 1)
    def _():
        y = acc_ref[...] + b_ref[...]
        y = jnp.maximum(y, 0.0)
        o_ref[...] = (y * y * y).astype(o_ref.dtype)


def _tiled_linear_relu3_res_kernel(x_ref, wt_ref, b_ref, res_ref, o_ref, acc_ref):
    @pl.when(pl.program_id(2) == 0)
    def _():
        acc_ref[...] = jnp.zeros_like(acc_ref)

    acc_ref[...] += jnp.dot(x_ref[...].astype(wt_ref.dtype), wt_ref[...],
                            preferred_element_type=jnp.float32)

    @pl.when(pl.program_id(2) == pl.num_programs(2) - 1)
    def _():
        y = acc_ref[...] + b_ref[...]
        y = jnp.maximum(y, 0.0)
        o_ref[...] = (y * y * y + res_ref[...].astype(jnp.float32)).astype(o_ref.dtype)


def _pick_tile(total: int, candidates=(512, 256, 128)) -> int:
    for c in candidates:
        if total % c == 0:
            return c
    return LANES


def _tiled_linear_relu3(x, wt, bias, residual, out_dtype, TM, TN, TK, limit_cap):
    """out = relu(x @ wt + bias)**3 (+ residual); all shapes pre-padded/aligned."""
    M, K = x.shape
    N = wt.shape[1]
    grid = (M // TM, N // TN, K // TK)

    x_isz = jnp.dtype(x.dtype).itemsize
    w_isz = jnp.dtype(wt.dtype).itemsize
    o_isz = jnp.dtype(out_dtype).itemsize
    step_bytes = (2 * (TM * TK * x_isz + TK * TN * w_isz + TM * TN * o_isz)
                  + TM * TN * 4 + 8 * TN * 4)
    if residual is not None:
        step_bytes += 2 * TM * TN * jnp.dtype(residual.dtype).itemsize
    vmem_limit = int(min(max(4 * step_bytes, 32 * 1024 * 1024), limit_cap))

    in_specs = [
        pl.BlockSpec((TM, TK), lambda i, j, k: (i, k)),
        pl.BlockSpec((TK, TN), lambda i, j, k: (k, j)),
        pl.BlockSpec((1, TN), lambda i, j, k: (0, j)),
    ]
    if residual is not None:
        in_specs.append(pl.BlockSpec((TM, TN), lambda i, j, k: (i, j)))
        kernel = _tiled_linear_relu3_res_kernel
        args = (x, wt, bias, residual)
    else:
        kernel = _tiled_linear_relu3_kernel
        args = (x, wt, bias)

    bytes_accessed = M * K * x_isz + K * N * w_isz + M * N * o_isz
    if residual is not None:
        bytes_accessed += M * N * jnp.dtype(residual.dtype).itemsize

    return pl.pallas_call(
        kernel,
        out_shape=jax.ShapeDtypeStruct((M, N), out_dtype),
        grid=grid,
        in_specs=in_specs,
        out_specs=pl.BlockSpec((TM, TN), lambda i, j, k: (i, j)),
        scratch_shapes=[pltpu.VMEM((TM, TN), jnp.float32)],
        compiler_params=pltpu.CompilerParams(
            dimension_semantics=("parallel", "parallel", "arbitrary"),
            vmem_limit_bytes=vmem_limit,
        ),
        cost_estimate=pl.CostEstimate(
            flops=2 * M * N * K, transcendentals=0,
            bytes_accessed=int(bytes_accessed)),
    )(*args)


def _tiled_residual_block(x, w1t, b1, w2t, b2, *, compute_dtype, out_dtype,
                          Fp, limit_cap):
    """Large-F fallback: weights streamed tile-by-tile (never shrink the batch
    tile below MXU-friendly sizes just to keep FxF weights resident)."""
    B, F = x.shape
    # M tile must satisfy sublane packing for x.dtype AND the compute_dtype
    # intermediate (bf16 packs 16 rows / vreg).
    m_align = max(8, 32 // jnp.dtype(out_dtype).itemsize,
                  32 // jnp.dtype(compute_dtype).itemsize)
    if B >= 256:
        TM = 256
    elif B >= 128:
        TM = 128
    else:
        TM = _round_up(B, m_align)
    Bp = _round_up(B, TM)
    TN = _pick_tile(Fp)
    TK = _pick_tile(Fp)

    padded = (Bp != B) or (Fp != F)
    xp = jnp.pad(x, ((0, Bp - B), (0, Fp - F))) if padded else x
    w1p = w1t.astype(compute_dtype)
    w2p = w2t.astype(compute_dtype)
    b1p = b1.astype(jnp.float32).reshape(1, F)
    b2p = b2.astype(jnp.float32).reshape(1, F)
    if Fp != F:
        w1p = jnp.pad(w1p, ((0, Fp - F), (0, Fp - F)))
        w2p = jnp.pad(w2p, ((0, Fp - F), (0, Fp - F)))
        b1p = jnp.pad(b1p, ((0, 0), (0, Fp - F)))
        b2p = jnp.pad(b2p, ((0, 0), (0, Fp - F)))

    # Layer 1: y1 = relu(x @ W1^T + b1)**3, emitted in compute_dtype (it is the
    # MXU input dtype of layer 2 anyway; halves intermediate HBM traffic).
    y1 = _tiled_linear_relu3(xp, w1p, b1p, None, compute_dtype, TM, TN, TK, limit_cap)
    # Layer 2: out = relu(y1 @ W2^T + b2)**3 + x (residual from pre-cast x).
    out = _tiled_linear_relu3(y1, w2p, b2p, xp, out_dtype, TM, TN, TK, limit_cap)
    return out[:B, :F] if padded else out


# ---------------------------------------------------------------------------
# Public wrapper.
# ---------------------------------------------------------------------------
def residual_block(x, w1t, b1, w2t, b2, *, compute_dtype=jnp.float32,
                   max_batch_tile=None, force_tiled=False):
    """Fused ResidualBlock forward.

    x:        (B, F)
    w1t, w2t: (F, F) weights already in (in, out) layout, i.e. PyTorch
              weight.T done ONCE at init time (not per call).
    b1, b2:   (F,)
    compute_dtype: dtype fed to the MXU.  jnp.bfloat16 is the fast path on ALL
                   TPU generations (v5e/v6e/v7x MXUs are bf16-native);
                   accumulation and the relu**3 epilogue are always f32.
                   jnp.float32 (default) matches the PyTorch reference exactly.
    """
    B, F = x.shape
    out_dtype = x.dtype
    x_isz = jnp.dtype(x.dtype).itemsize
    w_isz = jnp.dtype(compute_dtype).itemsize

    Fp = _round_up(max(F, LANES), LANES)
    sublanes = max(8, 32 // x_isz)             # 8 for f32, 16 for bf16

    # ---- generation-aware VMEM budgeting (per TensorCore) -----------------
    cap = _vmem_capacity_bytes()
    tb_budget = (cap * 3) // 4                 # ≈48 MiB on v7x, ≈96 MiB on v5e/v6e
    limit_cap = cap - 8 * 1024 * 1024          # headroom for Mosaic scratch
    if max_batch_tile is None:
        max_batch_tile = 1024 if cap >= 96 * 1024 * 1024 else 512

    # Resident footprint of the fused path: weights/biases SINGLE-buffered.
    weight_bytes = 2 * Fp * Fp * w_isz
    bias_bytes = 2 * 8 * Fp * 4
    x_bufs = 3 if Fp <= 1024 else 2            # extra x buffer when HBM-bound
    per_row = (x_bufs + 2) * Fp * x_isz + 4 * Fp * 4

    tb_floor = min(_round_up(B, sublanes), 128)
    fused_ok = (not force_tiled) and (
        weight_bytes + bias_bytes + tb_floor * per_row <= tb_budget)

    if not fused_ok:
        # Weights don't fit residency at a sane batch tile: tile N/K instead of
        # degenerating to TB=8 (keeps MXU-shaped tiles, stays compute-bound).
        return _tiled_residual_block(
            x, w1t, b1, w2t, b2, compute_dtype=compute_dtype,
            out_dtype=out_dtype, Fp=Fp, limit_cap=limit_cap)

    # ---- batch tile: MXU-aligned when B allows, largest fitting budget ----
    m_align = 256 if B >= 256 else (128 if B >= 128 else sublanes)
    tb = min(_round_up(max_batch_tile, m_align), _round_up(B, m_align))
    while tb > tb_floor and weight_bytes + bias_bytes + tb * per_row > tb_budget:
        tb = max(tb_floor, _round_up(tb // 2, sublanes))
    TB = max(tb_floor, tb)
    Bp = _round_up(B, TB)

    vmem_need = weight_bytes + bias_bytes + TB * per_row
    vmem_limit = int(min(max(vmem_need + 8 * 1024 * 1024, 32 * 1024 * 1024),
                         limit_cap))

    # ---- zero-pad only when needed (padding cannot change in-range result) -
    padded = (Bp != B) or (Fp != F)
    xp = jnp.pad(x, ((0, Bp - B), (0, Fp - F))) if padded else x
    w1p = w1t.astype(compute_dtype)
    w2p = w2t.astype(compute_dtype)
    b1p = b1.astype(jnp.float32).reshape(1, F)
    b2p = b2.astype(jnp.float32).reshape(1, F)
    if Fp != F:
        w1p = jnp.pad(w1p, ((0, Fp - F), (0, Fp - F)))
        w2p = jnp.pad(w2p, ((0, Fp - F), (0, Fp - F)))
        b1p = jnp.pad(b1p, ((0, 0), (0, Fp - F)))
        b2p = jnp.pad(b2p, ((0, 0), (0, Fp - F)))

    out_pad = pl.pallas_call(
        _fused_kernel,
        out_shape=jax.ShapeDtypeStruct((Bp, Fp), out_dtype),
        grid=(Bp // TB,),
        in_specs=[
            # x streamed over batch (triple-buffered when small-F / HBM-bound)
            _spec((TB, Fp), lambda i: (i, 0), buffers=3 if x_bufs == 3 else None),
            # grid-invariant operands: single-buffered VMEM residents
            _spec((Fp, Fp), lambda i: (0, 0), buffers=1),   # W1^T
            _spec((1, Fp), lambda i: (0, 0), buffers=1),    # b1
            _spec((Fp, Fp), lambda i: (0, 0), buffers=1),   # W2^T
            _spec((1, Fp), lambda i: (0, 0), buffers=1),    # b2
        ],
        out_specs=pl.BlockSpec((TB, Fp), lambda i: (i, 0)),
        # Alias the padded temp into the output only when a temp actually
        # exists (otherwise XLA would insert a defensive copy of the caller x).
        input_output_aliases={0: 0} if padded else {},
        compiler_params=pltpu.CompilerParams(
            dimension_semantics=("parallel",),   # shard batch across TCs (v7x)
            vmem_limit_bytes=vmem_limit,
        ),
        cost_estimate=pl.CostEstimate(
            flops=4 * Bp * Fp * Fp,              # two (Bp,Fp)x(Fp,Fp) matmuls
            transcendentals=0,
            bytes_accessed=(2 * Bp * Fp * x_isz + 2 * Fp * Fp * w_isz
                            + 2 * Fp * 4),
        ),
    )(xp, w1p, b1p, w2p, b2p)

    return out_pad[:B, :F] if padded else out_pad


def reference(x, w1, b1, w2, b2):
    """Plain-JAX mirror of the PyTorch module (w1/w2 in (out, in) layout)."""
    y = x @ w1.T + b1
    y = jnp.maximum(y, 0.0) ** 3
    y = y @ w2.T + b2
    y = jnp.maximum(y, 0.0) ** 3 + x
    return y


def _make_params(key, B, F):
    kx, kw1, kb1, kw2, kb2 = jax.random.split(key, 5)
    bound = 1.0 / jnp.sqrt(jnp.float32(F))
    x = jax.random.normal(kx, (B, F), jnp.float32)
    w1 = jax.random.uniform(kw1, (F, F), jnp.float32, -bound, bound)
    b1 = jax.random.uniform(kb1, (F,), jnp.float32, -bound, bound)
    w2 = jax.random.uniform(kw2, (F, F), jnp.float32, -bound, bound)
    b2 = jax.random.uniform(kb2, (F,), jnp.float32, -bound, bound)
    return x, w1, b1, w2, b2


if __name__ == "__main__":
    key = jax.random.PRNGKey(0)
    k_small, k_big = jax.random.split(key)

    # ---- fused path (weights VMEM-resident), small shapes -----------------
    B, F = 8, 32
    x, w1, b1, w2, b2 = _make_params(k_small, B, F)
    w1t, w2t = w1.T, w2.T                      # transpose ONCE at init time
    ref = reference(x, w1, b1, w2, b2)

    fwd_f32 = jax.jit(functools.partial(residual_block, compute_dtype=jnp.float32))
    out_f32 = jax.block_until_ready(fwd_f32(x, w1t, b1, w2t, b2))
    assert out_f32.shape == (B, F) and out_f32.dtype == x.dtype
    assert jnp.allclose(out_f32, ref, rtol=1e-5, atol=1e-5), "f32 mismatch vs reference"

    # bf16 MXU operands (fast path on v5e / v6e / v7x); f32 accumulation.
    fwd_bf16 = jax.jit(functools.partial(residual_block, compute_dtype=jnp.bfloat16))
    out_bf16 = jax.block_until_ready(fwd_bf16(x, w1t, b1, w2t, b2))
    assert jnp.allclose(out_bf16, ref, rtol=5e-2, atol=5e-2), "bf16 mismatch vs reference"

    # ---- tiled (large-F) fallback path, forced at a small shape ------------
    Bt, Ft = 16, 300                            # Fp=384 -> 3x3 N/K tiles per layer
    xt, w1b, b1b, w2b, b2b = _make_params(k_big, Bt, Ft)
    reft = reference(xt, w1b, b1b, w2b, b2b)
    fwd_tiled = jax.jit(functools.partial(residual_block,
                                          compute_dtype=jnp.float32,
                                          force_tiled=True))
    out_tiled = jax.block_until_ready(fwd_tiled(xt, w1b.T, b1b, w2b.T, b2b))
    assert out_tiled.shape == (Bt, Ft) and out_tiled.dtype == xt.dtype
    assert jnp.allclose(out_tiled, reft, rtol=1e-4, atol=1e-4), "tiled mismatch vs reference"

    print("KERNEL_OK")
</pallas_src>

<mosaic_0001>
module attributes {stable_mosaic.version = 11 : i64} {
  func.func @_probe_kernel(%arg0: i32, %arg1: memref<8x128xf32, #tpu.memory_space<vmem>>, %arg2: memref<8x128xf32, #tpu.memory_space<vmem>>) attributes {dimension_semantics = [#tpu.dimension_semantics<arbitrary>], iteration_bounds = array<i64: 1>, scalar_prefetch = 0 : i64, scratch_operands = 0 : i64, tpu.core_type = #tpu.core_type<tc>, window_params = [{pipeline_mode = #tpu.pipeline_mode<synchronous>, transform_indices = @transform_0, window_bounds = array<i64: 8, 128>}, {pipeline_mode = #tpu.pipeline_mode<synchronous>, transform_indices = @transform_1, window_bounds = array<i64: 8, 128>}]} {
    %c0 = arith.constant 0 : index
    %c0_0 = arith.constant 0 : index
    %0 = vector.load %arg1[%c0, %c0_0] : memref<8x128xf32, #tpu.memory_space<vmem>>, vector<8x128xf32>
    %cst = arith.constant 1.000000e+00 : f32
    %1 = vector.broadcast %cst : f32 to vector<8x128xf32>
    %2 = arith.addf %0, %1 : vector<8x128xf32>
    %c0_1 = arith.constant 0 : index
    %c0_2 = arith.constant 0 : index
    %3 = vector.load %arg2[%c0_1, %c0_2] : memref<8x128xf32, #tpu.memory_space<vmem>>, vector<8x128xf32>
    tpu.vector_store %arg2[%c0_1, %c0_2], %2 {strides = array<i32>} : memref<8x128xf32, #tpu.memory_space<vmem>>, vector<8x128xf32>,
    return
  }
  func.func @transform_0(%arg0: i32) -> (i32, i32) {
    %c0_i32 = arith.constant 0 : i32
    %c0_i32_0 = arith.constant 0 : i32
    %c0_i32_1 = arith.constant 0 : i32
    return %c0_i32, %c0_i32_0 : i32, i32
  }
  func.func @transform_1(%arg0: i32) -> (i32, i32) {
    %c0_i32 = arith.constant 0 : i32
    %c0_i32_0 = arith.constant 0 : i32
    %c0_i32_1 = arith.constant 0 : i32
    return %c0_i32, %c0_i32_0 : i32, i32
  }
}

module attributes {stable_mosaic.version = 11 : i64} {
  func.func @_fused_kernel(%arg0: i32, %arg1: memref<8x128xf32, #tpu.memory_space<vmem>>, %arg2: memref<128x128xf32, #tpu.memory_space<vmem>>, %arg3: memref<1x128xf32, #tpu.memory_space<vmem>>, %arg4: memref<128x128xf32, #tpu.memory_space<vmem>>, %arg5: memref<1x128xf32, #tpu.memory_space<vmem>>, %arg6: memref<8x128xf32, #tpu.memory_space<vmem>>) attributes {dimension_semantics = [#tpu.dimension_semantics<parallel>], iteration_bounds = array<i64: 1>, scalar_prefetch = 0 : i64, scratch_operands = 0 : i64, tpu.core_type = #tpu.core_type<tc>, window_params = [{transform_indices = @transform_0, window_bounds = array<i64: 8, 128>}, {pipeline_mode = #tpu.pipeline_mode<synchronous>, transform_indices = @transform_1, window_bounds = array<i64: 128, 128>}, {pipeline_mode = #tpu.pipeline_mode<synchronous>, transform_indices = @transform_2, window_bounds = array<i64: 1, 128>}, {pipeline_mode = #tpu.pipeline_mode<synchronous>, transform_indices = @transform_3, window_bounds = array<i64: 128, 128>}, {pipeline_mode = #tpu.pipeline_mode<synchronous>, transform_indices = @transform_4, window_bounds = array<i64: 1, 128>}, {transform_indices = @transform_5, window_bounds = array<i64: 8, 128>}]} {
    %c0 = arith.constant 0 : index
    %c0_0 = arith.constant 0 : index
    %0 = vector.load %arg1[%c0, %c0_0] : memref<8x128xf32, #tpu.memory_space<vmem>>, vector<8x128xf32>
    %c0_1 = arith.constant 0 : index
    %c0_2 = arith.constant 0 : index
    %1 = vector.load %arg2[%c0_1, %c0_2] : memref<128x128xf32, #tpu.memory_space<vmem>>, vector<128x128xf32>
    %cst = arith.constant dense<0.000000e+00> : vector<8x128xf32>
    %2 = tpu.matmul %0, %1, %cst {dimension_numbers = #tpu.dot_dimension_numbers<[1], [0], [0], [1], [0, 0, 1, 1], [], []>} : vector<8x128xf32>, vector<128x128xf32>, vector<8x128xf32> -> vector<8x128xf32>
    %c0_3 = arith.constant 0 : index
    %c0_4 = arith.constant 0 : index
    %3 = vector.load %arg3[%c0_3, %c0_4] : memref<1x128xf32, #tpu.memory_space<vmem>>, vector<1x128xf32>
    %4 = vector.broadcast %3 : vector<1x128xf32> to vector<8x128xf32>
    %5 = arith.addf %2, %4 : vector<8x128xf32>
    %cst_5 = arith.constant 0.000000e+00 : f32
    %6 = vector.broadcast %cst_5 : f32 to vector<8x128xf32>
    %7 = arith.maximumf %5, %6 : vector<8x128xf32>
    %8 = arith.mulf %7, %7 : vector<8x128xf32>
    %9 = arith.mulf %8, %7 : vector<8x128xf32>
    %c0_6 = arith.constant 0 : index
    %c0_7 = arith.constant 0 : index
    %10 = vector.load %arg4[%c0_6, %c0_7] : memref<128x128xf32, #tpu.memory_space<vmem>>, vector<128x128xf32>
    %cst_8 = arith.constant dense<0.000000e+00> : vector<8x128xf32>
    %11 = tpu.matmul %9, %10, %cst_8 {dimension_numbers = #tpu.dot_dimension_numbers<[1], [0], [0], [1], [0, 0, 1, 1], [], []>} : vector<8x128xf32>, vector<128x128xf32>, vector<8x128xf32> -> vector<8x128xf32>
    %c0_9 = arith.constant 0 : index
    %c0_10 = arith.constant 0 : index
    %12 = vector.load %arg5[%c0_9, %c0_10] : memref<1x128xf32, #tpu.memory_space<vmem>>, vector<1x128xf32>
    %13 = vector.broadcast %12 : vector<1x128xf32> to vector<8x128xf32>
    %14 = arith.addf %11, %13 : vector<8x128xf32>
    %cst_11 = arith.constant 0.000000e+00 : f32
    %15 = vector.broadcast %cst_11 : f32 to vector<8x128xf32>
    %16 = arith.maximumf %14, %15 : vector<8x128xf32>
    %17 = arith.mulf %16, %16 : vector<8x128xf32>
    %18 = arith.mulf %17, %16 : vector<8x128xf32>
    %19 = arith.addf %18, %0 : vector<8x128xf32>
    %c0_12 = arith.constant 0 : index
    %c0_13 = arith.constant 0 : index
    %20 = vector.load %arg6[%c0_12, %c0_13] : memref<8x128xf32, #tpu.memory_space<vmem>>, vector<8x128xf32>
    tpu.vector_store %arg6[%c0_12, %c0_13], %19 {strides = array<i32>} : memref<8x128xf32, #tpu.memory_space<vmem>>, vector<8x128xf32>,
    return
  }
  func.func @transform_0(%arg0: i32) -> (i32, i32) {
    %c0_i32 = arith.constant 0 : i32
    %c0_i32_0 = arith.constant 0 : i32
    return %arg0, %c0_i32 : i32, i32
  }
  func.func @transform_1(%arg0: i32) -> (i32, i32) {
    %c0_i32 = arith.constant 0 : i32
    %c0_i32_0 = arith.constant 0 : i32
    %c0_i32_1 = arith.constant 0 : i32
    return %c0_i32, %c0_i32_0 : i32, i32
  }
  func.func @transform_2(%arg0: i32) -> (i32, i32) {
    %c0_i32 = arith.constant 0 : i32
    %c0_i32_0 = arith.constant 0 : i32
    %c0_i32_1 = arith.constant 0 : i32
    return %c0_i32, %c0_i32_0 : i32, i32
  }
  func.func @transform_3(%arg0: i32) -> (i32, i32) {
    %c0_i32 = arith.constant 0 : i32
    %c0_i32_0 = arith.constant 0 : i32
    %c0_i32_1 = arith.constant 0 : i32
    return %c0_i32, %c0_i32_0 : i32, i32
  }
  func.func @transform_4(%arg0: i32) -> (i32, i32) {
    %c0_i32 = arith.constant 0 : i32
    %c0_i32_0 = arith.constant 0 : i32
    %c0_i32_1 = arith.constant 0 : i32
    return %c0_i32, %c0_i32_0 : i32, i32
  }
  func.func @transform_5(%arg0: i32) -> (i32, i32) {
    %c0_i32 = arith.constant 0 : i32
    %c0_i32_0 = arith.constant 0 : i32
    return %arg0, %c0_i32 : i32, i32
  }
}

</mosaic_0001>

<bundles_post_ra>
// kernel: tpu_custom_call.1
= control target key start
LH: loop header
LB: loop body
LE: loop exit
PB: predicated region body
PF: predicated region fallthrough
CT: control target
= control target key end

     0   :  { %6 = vsyncpa [#allocation3], 0  ;;  %s115_s0 = inlined_call_operand.hbm [shape: f32[8,128], index: 0, kind: input, shape index: {}]   ;;  %s116_s1 = inlined_call_operand.hbm [shape: f32[8,128], index: 1, kind: output, shape index: {}]  }
   0x1   :  { %7 = vsyncpa [#allocation4], 0  ;;  %s13_s8 = sshll.u32 %s115_s0, 4  ;;  %s97_s9 = smov [#allocation2]   ;;  %s14_s8 = int_to_ptr.hbm [resolvable:$true] %s13_s8 }
   0x2   :  { %s15_s10 = sshll.u32 %s97_s9, 4  ;;  %s16_s10 = int_to_ptr.vmem [resolvable:$true] %s15_s10 }
   0x3   :  { %18 = dma.hbm_to_vmem [thread:$0]  %s14_s8, 128, %s16_s10, [#allocation3]  }
   0x4   :  { %93 = dma.done.wait [#allocation3], 128  }
   0x5   :  { %94 = vsyncadd [#allocation3], 4294967168  ;;  %s98_s11 = smov [#allocation5]   ;;  %s33_s15 = sshll.u32 %s116_s1, 4  ;;  %v23_v0 = vld [vmem:[#allocation2] sm:$0xff]  ;;  %s34_s15 = int_to_ptr.hbm [resolvable:$true] %s33_s15 }
   0x6   :  { %s31_s12 = sshll.u32 %s98_s11, 4  ;;  %v24_v1 = vadd.f32 1.0, %v23_v0  ;;  %s32_s12 = int_to_ptr.vmem [resolvable:$true] %s31_s12 }
   0x8   :  { %25 = vst [vmem:[#allocation5] sm:$0xff] %v24_v1 }
   0x9   :  { %36 = dma.vmem_to_hbm [thread:$0]  %s32_s12, 128, %s34_s15, [#allocation4]  }
   0xa   :  { %95 = dma.done.wait [#allocation4], 128  }
   0xb   :  { %96 = vsyncadd [#allocation4], 4294967168 }
   0xc   :  { %41 = vsyncpa [#allocation3], 1 }
   0xd   :  { %42 = vsyncpa [#allocation4], 1 }

// kernel: residual_block.1
= control target key start
LH: loop header
LB: loop body
LE: loop exit
PB: predicated region body
PF: predicated region fallthrough
CT: control target
= control target key end

     0   :  { %s253_s1 = inlined_call_operand.vmem [shape: f32[128,128], index: 1, kind: input, shape index: {}]   ;;  %s254_s3 = inlined_call_operand.vmem [shape: f32[128,128], index: 3, kind: input, shape index: {}]   ;;  %s255_s2 = inlined_call_operand.vmem [shape: f32[1,128], index: 2, kind: input, shape index: {}]   ;;  %s256_s0 = inlined_call_operand.vmem [shape: f32[8,128], index: 0, kind: input, shape index: {}, may-alias: {0,5}]   ;;  %s257_s4 = inlined_call_operand.vmem [shape: f32[1,128], index: 4, kind: input, shape index: {}]   ;;  %s258_s5 = inlined_call_operand.vmem [shape: f32[8,128], index: 5, kind: output, shape index: {}, may-alias: {0,5}]  }
   0x1   :  { %v36_v0 = vld [vmem:[%s253_s1 + $0x78] sm:$0xff]  ;;  %v35_v1 = vld [vmem:[%s253_s1 + $0x70] sm:$0xff]  ;;  %v34_v2 = vld [vmem:[%s253_s1 + $0x68] sm:$0xff] }
   0x2   :  { %41 = vmatpush.msra.mxu0 %v36_v0  ;;  %v33_v3 = vld [vmem:[%s253_s1 + $0x60] sm:$0xff]  ;;  %v79_v4 = vld [vmem:[%s254_s3 + $0x78] sm:$0xff]  ;;  %v78_v6 = vld [vmem:[%s254_s3 + $0x70] sm:$0xff] }
   0x3   :  { %v32_v5 = vld [vmem:[%s253_s1 + $0x58] sm:$0xff]  ;;  %84 = vmatpush.msra.mxu1 %v79_v4  ;;  %v77_v7 = vld [vmem:[%s254_s3 + $0x68] sm:$0xff]  ;;  %v31_v8 = vld [vmem:[%s253_s1 + $0x50] sm:$0xff] }
   0x4   :  { %42 = vmatpush.msra.mxu0 %v35_v1  ;;  %v76_v9 = vld [vmem:[%s254_s3 + $0x60] sm:$0xff]  ;;  %v30_v10 = vld [vmem:[%s253_s1 + $0x48] sm:$0xff]  ;;  %v75_v11 = vld [vmem:[%s254_s3 + $0x58] sm:$0xff] }
   0x5   :  { %85 = vmatpush.msra.mxu1 %v78_v6  ;;  %v29_v12 = vld [vmem:[%s253_s1 + $0x40] sm:$0xff]  ;;  %v74_v13 = vld [vmem:[%s254_s3 + $0x50] sm:$0xff]  ;;  %v28_v14 = vld [vmem:[%s253_s1 + $0x38] sm:$0xff] }
   0x6   :  { %43 = vmatpush.msra.mxu0 %v34_v2  ;;  %v73_v15 = vld [vmem:[%s254_s3 + $0x48] sm:$0xff]  ;;  %v27_v16 = vld [vmem:[%s253_s1 + $0x30] sm:$0xff]  ;;  %v72_v17 = vld [vmem:[%s254_s3 + $0x40] sm:$0xff] }
   0x7   :  { %86 = vmatpush.msra.mxu1 %v77_v7  ;;  %v26_v18 = vld [vmem:[%s253_s1 + $0x28] sm:$0xff]  ;;  %v71_v19 = vld [vmem:[%s254_s3 + $0x38] sm:$0xff]  ;;  %v25_v20 = vld [vmem:[%s253_s1 + $0x20] sm:$0xff] }
   0x8   :  { %44 = vmatpush.msra.mxu0 %v33_v3  ;;  %v70_v21 = vld [vmem:[%s254_s3 + $0x30] sm:$0xff]  ;;  %v24_v22 = vld [vmem:[%s253_s1 + $0x18] sm:$0xff]  ;;  %v69_v23 = vld [vmem:[%s254_s3 + $0x28] sm:$0xff] }
   0x9   :  { %87 = vmatpush.msra.mxu1 %v76_v9  ;;  %v23_v24 = vld [vmem:[%s253_s1 + $0x10] sm:$0xff]  ;;  %v22_v25 = vld [vmem:[%s253_s1 + $0x8] sm:$0xff]  ;;  %v21_v26 = vld [vmem:[%s253_s1] sm:$0xff] }
   0xa   :  { %45 = vmatpush.msra.mxu0 %v32_v5  ;;  %v20_v27 = vld [vmem:[%s256_s0] sm:$0xff]  ;;  %v67_v29 = vld [vmem:[%s254_s3 + $0x18] sm:$0xff]  ;;  %v66_v30 = vld [vmem:[%s254_s3 + $0x10] sm:$0xff] }
   0xb   :  { %88 = vmatpush.msra.mxu1 %v75_v11  ;;  %v68_v28 = vld [vmem:[%s254_s3 + $0x20] sm:$0xff]  ;;  %v65_v31 = vld [vmem:[%s254_s3 + $0x8] sm:$0xff] }
   0xc   :  { %46 = vmatpush.msra.mxu0 %v31_v8  ;;  %v64_v32 = vld [vmem:[%s254_s3] sm:$0xff] }
   0xd   :  { %89 = vmatpush.msra.mxu1 %v74_v13  ;;  %v113_v33 = vld [vmem:[%s255_s2] ss:$0 sm:$0xff] }
   0xe   :  { %47 = vmatpush.msra.mxu0 %v30_v10  ;;  %v114_v39 = vld [vmem:[%s257_s4] ss:$0 sm:$0xff] }
   0xf   :  { %90 = vmatpush.msra.mxu1 %v73_v15 }
  0x10   :  { %48 = vmatpush.msra.mxu0 %v29_v12 }
  0x11   :  { %91 = vmatpush.msra.mxu1 %v72_v17 }
  0x12   :  { %49 = vmatpush.msra.mxu0 %v28_v14 }
  0x13   :  { %92 = vmatpush.msra.mxu1 %v71_v19 }
  0x14   :  { %50 = vmatpush.msra.mxu0 %v27_v16 }
  0x15   :  { %93 = vmatpush.msra.mxu1 %v70_v21 }
  0x16   :  { %51 = vmatpush.msra.mxu0 %v26_v18 }
  0x17   :  { %94 = vmatpush.msra.mxu1 %v69_v23 }
  0x18   :  { %52 = vmatpush.msra.mxu0 %v25_v20 }
  0x19   :  { %95 = vmatpush.msra.mxu1 %v68_v28 }
  0x1a   :  { %53 = vmatpush.msra.mxu0 %v24_v22 }
  0x1b   :  { %96 = vmatpush.msra.mxu1 %v67_v29 }
  0x1c   :  { %54 = vmatpush.msra.mxu0 %v23_v24 }
  0x1d   :  { %97 = vmatpush.msra.mxu1 %v66_v30 }
  0x1e   :  { %55 = vmatpush.msra.mxu0 %v22_v25 }
  0x1f   :  { %98 = vmatpush.msra.mxu1 %v65_v31 }
  0x20   :  { %56 = vmatpush.msra.mxu0 %v21_v26 }
  0x21   :  { %57 = vmatmul.f32.vlgmr.msra.gmra.mxu0 %v20_v27  ;;  %99 = vmatpush.msra.mxu1 %v64_v32 }
  0x9e   :  { %v58_v34 = vpop.f32.mrf.mxu0 }
  0x9f   :  { %v59_v35 = vadd.f32 %v113_v33, %v58_v34 }
  0xa1   :  { %v61_v36 = vmax.f32 %v59_v35, 0.0 }
  0xa3   :  { %v62_v37 = vmul.f32 %v61_v36, %v61_v36 }
  0xa5   :  { %v63_v38 = vmul.f32 %v62_v37, %v61_v36 }
  0xa7   :  { %100 = vmatmul.f32.vlgmr.msra.gmra.mxu1 %v63_v38 }
 0x124   :  { %v101_v40 = vpop.f32.mrf.mxu1 }
 0x125   :  { %v102_v41 = vadd.f32 %v114_v39, %v101_v40 }
 0x127   :  { %v104_v42 = vmax.f32 %v102_v41, 0.0 }
 0x129   :  { %v105_v43 = vmul.f32 %v104_v42, %v104_v42 }
 0x12b   :  { %v106_v44 = vmul.f32 %v105_v43, %v104_v42 }
 0x12d   :  { %v107_v45 = vadd.f32 %v106_v44, %v20_v27 }
 0x12f   :  { %108 = vst [vmem:[%s258_s5] sm:$0xff] %v107_v45 }

</bundles_post_ra>
